<compile_context>
chip_gen: v5e
topology: v5e:2x2
jax: 0.10.0
libtpu: 0.0.40
codegen_flags: <defaults>
</compile_context>

<pallas_src>
import functools
import math

import jax
import jax.numpy as jnp
from jax.experimental import pallas as pl
from jax.experimental.pallas import tpu as pltpu  # noqa: F401  (TPU backend)


def _time_encoder_kernel(t_ref, o_ref, *, half, neg_log_timescale):
    """t_ref: (B, 1) f32 times.  o_ref: (B, 2*half) f32 = [sin(t*f) | cos(t*f)]."""
    B = o_ref.shape[0]
    # Frequency index 0..half-1 along the lane axis (TPU requires >=2-D iota).
    k = jax.lax.broadcasted_iota(jnp.int32, (B, half), dimension=1).astype(jnp.float32)
    freqs = jnp.exp(k * neg_log_timescale)          # (B, half), EUP exp
    args = t_ref[...] * freqs                       # (B, 1) lane-broadcast * (B, half)
    o_ref[:, :half] = jnp.sin(args)                 # lane-dense store, lanes [0, half)
    o_ref[:, half:] = jnp.cos(args)                 # lane-dense store, lanes [half, dim)


def time_encoder(t, dim=256):
    """Sinusoidal time encoding: t [B] -> [B, dim] (matches TimeEncoder.forward)."""
    B = t.shape[0]
    half = dim // 2
    denom = max(half - 1, 1)                        # guard dim == 2 (reference would divide by 0)
    kernel = functools.partial(
        _time_encoder_kernel,
        half=half,
        neg_log_timescale=-(math.log(10000.0) / denom),
    )
    return pl.pallas_call(
        kernel,
        out_shape=jax.ShapeDtypeStruct((B, dim), jnp.float32),
        # Single invocation (empty grid): whole arrays are one VMEM block each.
        in_specs=[pl.BlockSpec((B, 1), lambda: (0, 0))],
        out_specs=pl.BlockSpec((B, dim), lambda: (0, 0)),
    )(t.astype(jnp.float32).reshape(B, 1))


if __name__ == "__main__":
    B, dim = 2, 256                                 # TimeEncoder default dim=256, small batch
    t = jax.random.uniform(jax.random.PRNGKey(0), (B,), jnp.float32)

    emb = jax.block_until_ready(time_encoder(t, dim=dim))

    # Pure-JAX reference mirroring the PyTorch forward exactly.
    half = dim // 2
    freqs = jnp.exp(jnp.arange(half, dtype=jnp.float32)
                    * -(math.log(10000.0) / (half - 1)))
    args = t[:, None] * freqs[None, :]
    ref = jnp.concatenate([jnp.sin(args), jnp.cos(args)], axis=-1)

    assert emb.shape == (B, dim) and emb.dtype == jnp.float32
    assert bool(jnp.all(jnp.isfinite(emb)))
    assert bool(jnp.allclose(emb, ref, atol=1e-5, rtol=1e-5))
    print("KERNEL_OK")
</pallas_src>

<mosaic_0001>
module attributes {stable_mosaic.version = 11 : i64} {
  func.func @_time_encoder_kernel(%arg0: memref<2x1xf32, #tpu.memory_space<vmem>>, %arg1: memref<2x256xf32, #tpu.memory_space<vmem>>) attributes {dimension_semantics = [], scalar_prefetch = 0 : i64, scratch_operands = 0 : i64, tpu.core_type = #tpu.core_type<tc>} {
    %0 = tpu.iota {dimensions = array<i32: 1>} : vector<2x128xi32>
    %1 = arith.sitofp %0 : vector<2x128xi32> to vector<2x128xf32>
    %cst = arith.constant -0.0725223646 : f32
    %2 = vector.broadcast %cst : f32 to vector<2x128xf32>
    %3 = arith.mulf %1, %2 : vector<2x128xf32>
    %4 = math.exp %3 : vector<2x128xf32>
    %c0 = arith.constant 0 : index
    %c0_0 = arith.constant 0 : index
    %5 = vector.load %arg0[%c0, %c0_0] : memref<2x1xf32, #tpu.memory_space<vmem>>, vector<2x1xf32>
    %6 = vector.broadcast %5 : vector<2x1xf32> to vector<2x128xf32>
    %7 = arith.mulf %6, %4 : vector<2x128xf32>
    %8 = math.sin %7 : vector<2x128xf32>
    %c0_1 = arith.constant 0 : index
    %c0_2 = arith.constant 0 : index
    %9 = vector.load %arg1[%c0_1, %c0_2] : memref<2x256xf32, #tpu.memory_space<vmem>>, vector<2x128xf32>
    tpu.vector_store %arg1[%c0_1, %c0_2], %8 {strides = array<i32>} : memref<2x256xf32, #tpu.memory_space<vmem>>, vector<2x128xf32>,
    %10 = math.cos %7 : vector<2x128xf32>
    %c0_3 = arith.constant 0 : index
    %c128 = arith.constant 128 : index
    %11 = vector.load %arg1[%c0_3, %c128] : memref<2x256xf32, #tpu.memory_space<vmem>>, vector<2x128xf32>
    tpu.vector_store %arg1[%c0_3, %c128], %10 {strides = array<i32>} : memref<2x256xf32, #tpu.memory_space<vmem>>, vector<2x128xf32>,
    return
  }
}

</mosaic_0001>

<bundles_post_ra>
// kernel: tpu_custom_call.1
= control target key start
LH: loop header
LB: loop body
LE: loop exit
PB: predicated region body
PF: predicated region fallthrough
CT: control target
= control target key end

     0   :  { %v392_v1 = vmov 0   ;;  %s477_s0 = inlined_call_operand.vmem [shape: f32[2,1], index: 0, kind: input, shape index: {}]   ;;  %s478_s1 = inlined_call_operand.hbm [shape: f32[2,256], index: 1, kind: output, shape index: {}]  }
   0x1   :  { %v15_v0 = vld [vmem:[%s477_s0] sm:$0x3]  ;;  %363 = vset.pattern.permute.xlu0 %v392_v1 }
   0x2   :  { %18 = vperm.xlu0 %363, %v15_v0  }
   0x3   :  { %6 = vsyncpa [#allocation3], 0  ;;  %v9_v2 = vlaneseq  ;;  %v393_v21 = vmov 683565275   ;;  %v394_v23 = vmov 2475754826  }
   0x4   :  { %v395_v26 = vmov 2131351028   ;;  %v396_v29 = vmov 2102212464   ;;  %v397_v32 = vmov 920167782  }
   0x5   :  { %v10_v3 = vand.u32 127, %v9_v2  ;;  %v398_v35 = vmov 1326507024   ;;  %s399_s0 = smov [#allocation2]   ;;  %s340_s11 = sshll.u32 %s478_s1, 4  ;;  %s341_s11 = int_to_ptr.hbm [resolvable:$true] %s340_s11 }
   0x6   :  { %s338_s8 = sshll.u32 %s399_s0, 4  ;;  %s339_s8 = int_to_ptr.vmem [resolvable:$true] %s338_s8 }
   0x7   :  { %v11_v4 = vcvt.s32.f32 %v10_v3 }
   0x9   :  { %v12_v5 = vmul.f32 -0.072522365, %v11_v4 }
   0xb   :  { %v13_v6 = vmul.f32 1.442695, %v12_v5 }
   0xd   :  { %364 = vpow2.f32 %v13_v6 }
  0x13   :  { %v365_v7 = vpop.eup %364 }
  0x74   :  { %v19_v8 = vpop.permute.xlu0 %18 }
  0x75   :  { %v414_v9 = vmul.f32 %v365_v7, %v19_v8 }
  0x77   :  { %v25_v10 = vand.u32 2139095040, %v414_v9  ;;  %v22_v13 = vand.u32 2147483647, %v414_v9  ;;  %vm24_vm12 = vcmp.lt.s32.totalorder %v414_v9, 0 }
  0x79   :  { %v26_v11 = vshrl.u32 %v25_v10, 23  ;;  %v29_v15 = vand.u32 8388607, %v22_v13  ;;  %vm23_vm13 = vcmp.le.f32.partialorder %v22_v13, 0.7853982 }
  0x7b   :  { %v349_v12 = vadd.s32 4294967169, %v26_v11  ;;  %v30_v19 = vor.u32 8388608, %v29_v15 }
  0x7d   :  { %v32_v14 = vadd.s32 1, %v349_v12  ;;  %v431_v42 = vshll.u32 %v30_v19, 8 }
  0x7f   :  { %vm33_vm0 = vcmp.gt.s32.totalorder %v32_v14, 0  ;;  %v71_v51 = vand.u32 65535, %v431_v42  ;;  %v72_v52 = vshrl.u32 %v431_v42, 16 }
  0x80   :  { %v34_v16 = vsel %vm33_vm0, %v32_v14, 0 }
  0x81   :  { %v36_v17 = vand.u32 31, %v34_v16  ;;  %v422_v20 = vshrl.u32 %v34_v16, 5 }
  0x83   :  { %v420_v18 = vsub.s32 32, %v36_v17  ;;  %v39_v22 = vshll.u32 %v393_v21, %v36_v17  ;;  %v42_v24 = vshll.u32 %v394_v23, %v36_v17  ;;  %v45_v28 = vshll.u32 %v395_v26, %v36_v17 }
  0x84   :  { %v48_v31 = vshll.u32 %v396_v29, %v36_v17  ;;  %v51_v34 = vshll.u32 %v397_v32, %v36_v17  ;;  %vm54_vm1 = vcmp.lt.s32.totalorder %v422_v20, 1  ;;  %vm57_vm2 = vcmp.lt.s32.totalorder %v422_v20, 4 }
  0x85   :  { %v40_v25 = vshrl.u32 %v394_v23, %v420_v18  ;;  %v43_v27 = vshrl.u32 %v395_v26, %v420_v18  ;;  %v46_v30 = vshrl.u32 %v396_v29, %v420_v18  ;;  %v49_v33 = vshrl.u32 %v397_v32, %v420_v18 }
  0x86   :  { %v52_v36 = vshrl.u32 %v398_v35, %v420_v18  ;;  %vm56_vm3 = vcmp.lt.s32.totalorder %v422_v20, 3  ;;  %vm55_vm4 = vcmp.lt.s32.totalorder %v422_v20, 2  ;;  %v38_v16 = vshrl.u32 %v393_v21, %v420_v18 }
  0x87   :  { %v41_v37 = vor.u32 %v40_v25, %v39_v22  ;;  %v44_v38 = vor.u32 %v43_v27, %v42_v24  ;;  %v47_v39 = vor.u32 %v46_v30, %v45_v28  ;;  %v50_v40 = vor.u32 %v49_v33, %v48_v31 }
  0x88   :  { %v53_v41 = vor.u32 %v52_v36, %v51_v34 }
  0x89   :  { %v62_v43 = vsel %vm54_vm1, %v41_v37, %v44_v38  ;;  %v66_v44 = vsel %vm54_vm1, %v44_v38, %v47_v39  ;;  %v63_v45 = vsel %vm57_vm2, %v50_v40, 920167782  ;;  %v59_v12 = vsel %vm57_vm2, %v47_v39, 2102212464 }
  0x8a   :  { %v67_v46 = vsel %vm57_vm2, %v53_v41, 1326507024  ;;  %v64_v47 = vsel %vm56_vm3, %v47_v39, %v63_v45  ;;  %v58_v25 = vsel %vm54_vm1, %v38_v16, %v41_v37  ;;  %v60_v26 = vsel %vm56_vm3, %v44_v38, %v59_v12 }
  0x8b   :  { %v68_v48 = vsel %vm56_vm3, %v50_v40, %v67_v46  ;;  %v65_v49 = vsel %vm55_vm4, %v62_v43, %v64_v47  ;;  %v61_v18 = vsel %vm55_vm4, %v58_v25, %v60_v26 }
  0x8c   :  { %v69_v50 = vsel %vm55_vm4, %v66_v44, %v68_v48  ;;  %v95_v55 = vand.u32 65535, %v65_v49  ;;  %v96_v56 = vshrl.u32 %v65_v49, 16  ;;  %v115_v33 = vmul.u32 %v431_v42, %v61_v18 }
  0x8d   :  { %v73_v53 = vand.u32 65535, %v69_v50  ;;  %v74_v54 = vshrl.u32 %v69_v50, 16  ;;  %vm165_vm4 = vweird.f32 %v414_v9 }
  0x8e   :  { %v98_v59 = vmul.u32 %v96_v56, %v71_v51  ;;  %v99_v60 = vmul.u32 %v95_v55, %v72_v52  ;;  %v97_v0 = vmul.u32 %v95_v55, %v71_v51  ;;  %v100_v5 = vmul.u32 %v96_v56, %v72_v52 }
  0x8f   :  { %v76_v57 = vmul.u32 %v74_v54, %v71_v51  ;;  %v77_v58 = vmul.u32 %v73_v53, %v72_v52  ;;  %v75_v61 = vmul.u32 %v73_v53, %v71_v51  ;;  %v78_v63 = vmul.u32 %v74_v54, %v72_v52 }
  0x90   :  { %v101_v2 = vshll.u32 %v98_v59, 16  ;;  %v103_v7 = vshll.u32 %v99_v60, 16  ;;  %v102_v23 = vshrl.u32 %v98_v59, 16  ;;  %v104_v29 = vshrl.u32 %v99_v60, 16 }
  0x91   :  { %v79_v62 = vshll.u32 %v76_v57, 16  ;;  %v81_v3 = vshll.u32 %v77_v58, 16  ;;  %v80_v17 = vshrl.u32 %v76_v57, 16  ;;  %v82_v27 = vshrl.u32 %v77_v58, 16 }
  0x92   :  { %vm105_vm6 = vc.u32 %v97_v0, %v101_v2  ;;  %v107_v8 = vadd.s32 %v101_v2, %v97_v0 }
  0x93   :  { %vm83_vm5 = vc.u32 %v75_v61, %v79_v62  ;;  %v85_v4 = vadd.s32 %v79_v62, %v75_v61  ;;  %v106_v11 = vsel %vm105_vm6, 1, %v392_v1 }
  0x94   :  { %v84_v6 = vsel %vm83_vm5, 1, %v392_v1  ;;  %v108_v15 = vadd.s32 %v106_v11, %v100_v5  ;;  %vm109_vm8 = vc.u32 %v107_v8, %v103_v7  ;;  %v111_v32 = vadd.s32 %v107_v8, %v103_v7 }
  0x95   :  { %v86_v10 = vadd.s32 %v84_v6, %v78_v63  ;;  %vm87_vm7 = vc.u32 %v85_v4, %v81_v3  ;;  %v110_v22 = vsel %vm109_vm8, 1, %v392_v1 }
  0x96   :  { %v88_v14 = vsel %vm87_vm7, 1, %v392_v1  ;;  %v112_v24 = vadd.s32 %v110_v22, %v108_v15 }
  0x97   :  { %v90_v19 = vadd.s32 %v88_v14, %v86_v10 }
  0x98   :  { %v113_v30 = vadd.s32 %v112_v24, %v102_v23 }
  0x99   :  { %v91_v28 = vadd.s32 %v90_v19, %v80_v17 }
  0x9a   :  { %v114_v21 = vadd.s32 %v113_v30, %v104_v29 }
  0x9b   :  { %v92_v31 = vadd.s32 %v91_v28, %v82_v27 }
  0x9c   :  { %v118_v1 = vadd.s32 1, %v114_v21 }
  0x9d   :  { %vm117_vm9 = vc.u32 %v92_v31, %v111_v32  ;;  %v116_v20 = vadd.s32 %v111_v32, %v92_v31 }
  0x9e   :  { %v119_v34 = vsel %vm117_vm9, %v118_v1, %v114_v21 }
  0x9f   :  { %v120_v35 = vadd.s32 %v119_v34, %v115_v33 }
  0xa1   :  { %v121_v36 = vadd.s32 536870912, %v120_v35 }
  0xa3   :  { %v122_v37 = vshrl.u32 %v121_v36, 30 }
  0xa5   :  { %v123_v39 = vshll.u32 %v122_v37, 30  ;;  %v146_v58 = vsub.s32 4, %v122_v37 }
  0xa7   :  { %v124_v38 = vsub.s32 %v120_v35, %v123_v39  ;;  %v147_v63 = vsel %vm24_vm12, %v146_v58, %v122_v37 }
  0xa8   :  { %v149_v3 = vsel %vm23_vm13, 0, %v147_v63 }
  0xa9   :  { %vm125_vm10 = vcmp.lt.s32.totalorder %v124_v38, 0  ;;  %v126_v40 = vsub.s32 0, %v124_v38  ;;  %v166_v8 = vadd.s32 3, %v149_v3  ;;  %v322_v14 = vand.u32 3, %v149_v3 }
  0xab   :  { %v127_v41 = vsel %vm125_vm10, %v126_v40, %v124_v38  ;;  %v167_v15 = vand.u32 3, %v166_v8  ;;  %vm323_vm14 = vcmp.lt.s32.totalorder %v322_v14, 2  ;;  %vm324_vm15 = vcmp.eq.s32.totalorder %v322_v14, 0 }
  0xac   :  { %v128_v43 = vclz %v127_v41  ;;  %vm327_vm3 = vcmp.eq.s32.totalorder %v322_v14, 2 }
  0xad   :  { %vm168_vm0 = vcmp.lt.s32.totalorder %v167_v15, 2  ;;  %vm169_vm1 = vcmp.eq.s32.totalorder %v167_v15, 0  ;;  %vm172_vm2 = vcmp.eq.s32.totalorder %v167_v15, 2 }
  0xae   :  { %v350_v44 = vadd.s32 4294967294, %v128_v43 }
  0xb0   :  { %vm351_vm11 = vcmp.lt.s32.totalorder %v350_v44, 0 }
  0xb1   :  { %v131_v45 = vsel %vm351_vm11, 0, %v350_v44 }
  0xb2   :  { %v132_v46 = vsub.s32 32, %v131_v45  ;;  %v136_v47 = vsub.s32 4294967266, %v131_v45  ;;  %v133_v48 = vshll.u32 %v124_v38, %v131_v45 }
  0xb4   :  { %v134_v49 = vshrl.u32 %v116_v20, %v132_v46  ;;  %v137_v50 = vadd.s32 127, %v136_v47 }
  0xb6   :  { %v135_v42 = vor.u32 %v134_v49, %v133_v48  ;;  %v138_v51 = vshll.u32 %v137_v50, 23 }
  0xb8   :  { %v139_v52 = vor.u32 4788187, %v138_v51  ;;  %v142_v54 = vcvt.s32.f32 %v135_v42 }
  0xba   :  { %v140_v53 = vand.u32 2147483647, %v139_v52 }
  0xbc   :  { %v143_v55 = vmul.f32 %v142_v54, %v140_v53 }
  0xbe   :  { %v144_v56 = vxor.u32 2147483648, %v143_v55 }
  0xc0   :  { %v145_v57 = vsel %vm24_vm12, %v144_v56, %v143_v55 }
  0xc1   :  { %v148_v59 = vsel %vm23_vm13, %v414_v9, %v145_v57 }
  0xc2   :  { %v150_v60 = vmul.f32 %v148_v59, %v148_v59 }
  0xc4   :  { %v151_v61 = vmul.f32 -0.001358992, %v150_v60  ;;  %v158_v62 = vmul.f32 -0.00019511016, %v150_v60 }
  0xc6   :  { %v152_v0 = vadd.f32 0.041655596, %v151_v61  ;;  %v159_v2 = vadd.f32 0.008332121, %v158_v62 }
  0xc8   :  { %v153_v4 = vmul.f32 %v152_v0, %v150_v60  ;;  %v160_v5 = vmul.f32 %v159_v2, %v150_v60 }
  0xca   :  { %v154_v6 = vadd.f32 -0.4999988, %v153_v4  ;;  %v161_v7 = vadd.f32 -0.16666654, %v160_v5 }
  0xcc   :  { %v155_v10 = vmul.f32 %v154_v6, %v150_v60  ;;  %v162_v11 = vmul.f32 %v161_v7, %v150_v60 }
  0xce   :  { %v156_v12 = vadd.f32 1.0, %v155_v10  ;;  %v163_v13 = vadd.f32 1.0, %v162_v11 }
  0xd0   :  { %v164_v16 = vmul.f32 %v163_v13, %v148_v59  ;;  %v173_v17 = vxor.u32 2147483648, %v156_v12 }
  0xd2   :  { %v170_v19 = vxor.u32 2147483648, %v164_v16  ;;  %v174_v23 = vsel %vm172_vm2, %v173_v17, %v164_v16  ;;  %v329_v25 = vsel %vm327_vm3, %v173_v17, %v164_v16 }
  0xd4   :  { %v171_v22 = vsel %vm169_vm1, %v156_v12, %v170_v19  ;;  %v326_v24 = vsel %vm324_vm15, %v156_v12, %v170_v19 }
  0xd5   :  { %v175_v26 = vsel %vm168_vm0, %v171_v22, %v174_v23  ;;  %v330_v27 = vsel %vm323_vm14, %v326_v24, %v329_v25 }
  0xd6   :  { %v176_v28 = vsel %vm165_vm4, nan, %v175_v26  ;;  %v331_v29 = vsel %vm165_vm4, nan, %v330_v27 }
  0xd7   :  { %177 = vst [vmem:[#allocation2] sm:$0x3] %v176_v28 }
  0xd8   :  { %332 = vst [vmem:[#allocation2 + $0x2] sm:$0x3] %v331_v29 }
  0xd9   :  { %343 = dma.vmem_to_hbm [thread:$0]  %s339_s8, 64, %s341_s11, [#allocation3]  }
  0xda   :  { %390 = dma.done.wait [#allocation3], 64  }
  0xdb   :  { %391 = vsyncadd [#allocation3], 4294967232 }
  0xdc   :  { %348 = vsyncpa [#allocation3], 1 }

</bundles_post_ra>
